<compile_context>
chip_gen: v7x
topology: tpu7x:2x2x1
jax: 0.10.0
libtpu: 0.0.40
codegen_flags: <defaults>
</compile_context>

<pallas_src>
import jax
import jax.numpy as jnp
from jax.experimental import pallas as pl
from jax.experimental.pallas import tpu as pltpu

_LANE = 128              # lane width — batch axis is padded to a multiple of this
_MAX_TILE_LANES = 32768  # lanes (samples) per grid step for large batches


def _testodef_kernel(p_ref, x_ref, o_ref):
    # p_ref : SMEM f32[10] = [x0_0, x0_1, A00, A01, A10, A11, B00, B01, B10, B11]
    # x_ref : VMEM (2, TB) — features on sublanes, batch samples on lanes
    # o_ref : VMEM (2, TB) — same layout
    x = x_ref[...].astype(jnp.float32)
    xa = x[0:1, :]                      # feature 0 of every sample, (1, TB)
    xb = x[1:2, :]                      # feature 1 of every sample, (1, TB)

    x0a = p_ref[0]
    x0b = p_ref[1]
    a00, a01, a10, a11 = p_ref[2], p_ref[3], p_ref[4], p_ref[5]
    b00, b01, b10, b11 = p_ref[6], p_ref[7], p_ref[8], p_ref[9]

    # xTx0 = sum(x * x0, dim=1): per-lane FMA, no cross-lane reduce.
    xtx0 = x0a * xa + x0b * xb          # (1, TB)

    # Single exp: sigmoid(z) = 1/(1+e^{-z}),  sigmoid(-z) = e^{-z}/(1+e^{-z}).
    e = jnp.exp(-xtx0)
    s_pos = pl.reciprocal(1.0 + e)
    s_neg = e * s_pos

    # nn.Linear(2, 2, bias=False): y = dx @ W.T  ->  y_j = W[j,0]*dx_0 + W[j,1]*dx_1
    dxa = xa - x0a
    dxb = xb - x0b
    sxa = xa + x0a
    sxb = xb + x0b

    out0 = s_pos * (a00 * dxa + a01 * dxb) + s_neg * (b00 * sxa + b01 * sxb)
    out1 = s_pos * (a10 * dxa + a11 * dxb) + s_neg * (b10 * sxa + b11 * sxb)

    o_ref[0:1, :] = out0.astype(o_ref.dtype)
    o_ref[1:2, :] = out1.astype(o_ref.dtype)


def testodef_forward(x, t, A_w, B_w, x0):
    """Pallas implementation of TestODEF.forward(x, t).

    t is accepted for API parity but unused (as in the PyTorch forward).
    """
    # TODO(synk): for the canonical batch==1 ODE-solver loop, fuse multiple RHS
    # evaluations / solver steps into a single pallas_call to amortize the fixed
    # kernel-launch + DMA-setup cost, which dominates a single (1, 2) evaluation.
    del t  # unused by TestODEF.forward
    bsz, feat = x.shape
    assert feat == 2
    orig_dtype = x.dtype

    # Pack the 10 parameter scalars for SMEM residence.
    params = jnp.concatenate(
        [x0.reshape(-1), A_w.reshape(-1), B_w.reshape(-1)]
    ).astype(jnp.float32)                                        # (10,)

    # Lane-dense (2, B) layout; pad batch to the lane tile.
    bp = pl.cdiv(bsz, _LANE) * _LANE
    if bp <= _MAX_TILE_LANES:
        tb = bp
    else:
        tb = _MAX_TILE_LANES
        bp = pl.cdiv(bsz, tb) * tb
    xT = jnp.pad(x.T.astype(jnp.float32), ((0, 0), (0, bp - bsz)))   # (2, bp)

    out = pl.pallas_call(
        _testodef_kernel,
        out_shape=jax.ShapeDtypeStruct((2, bp), jnp.float32),
        grid=(bp // tb,),
        in_specs=[
            pl.BlockSpec(memory_space=pltpu.MemorySpace.SMEM),   # params (whole, SMEM)
            pl.BlockSpec((2, tb), lambda i: (0, i)),             # x, lane-tiled on batch
        ],
        out_specs=pl.BlockSpec((2, tb), lambda i: (0, i)),
        compiler_params=pltpu.CompilerParams(
            dimension_semantics=("parallel",)),
    )(params, xT)

    return out[:, :bsz].T.astype(orig_dtype)


def _reference(x, A_w, B_w, x0):
    xTx0 = jnp.sum(x * x0, axis=1, keepdims=True)
    return (jax.nn.sigmoid(xTx0) * ((x - x0) @ A_w.T)
            + jax.nn.sigmoid(-xTx0) * ((x + x0) @ B_w.T))


if __name__ == "__main__":
    key = jax.random.PRNGKey(0)
    k_x, k_a, k_b, k_x0, k_xl = jax.random.split(key, 5)

    # Parameters (shapes from __init__: Linear(2,2) x2, x0 (1,2)).
    A_w = jax.random.normal(k_a, (2, 2), dtype=jnp.float32)
    B_w = jax.random.normal(k_b, (2, 2), dtype=jnp.float32)
    x0 = jax.random.normal(k_x0, (1, 2), dtype=jnp.float32)
    t = jnp.zeros((1, 1), dtype=jnp.float32)  # unused by forward

    # Canonical TestODEF usage: batch = 1 (spiral ODE demo) — matches PyTorch exactly.
    x1 = jax.random.normal(k_x, (1, 2), dtype=jnp.float32)
    out1 = jax.block_until_ready(testodef_forward(x1, t, A_w, B_w, x0))
    ref1 = _reference(x1, A_w, B_w, x0)
    assert out1.shape == (1, 2)
    assert jnp.allclose(out1, ref1, atol=1e-5, rtol=1e-5)

    # Non-multiple-of-128 batch exercises lane padding + the batch grid
    # (per-sample gating semantics, as documented above).
    xl = jax.random.normal(k_xl, (96, 2), dtype=jnp.float32)
    outl = jax.block_until_ready(testodef_forward(xl, t, A_w, B_w, x0))
    refl = _reference(xl, A_w, B_w, x0)
    assert outl.shape == (96, 2)
    assert jnp.allclose(outl, refl, atol=1e-5, rtol=1e-5)

    print("KERNEL_OK")
</pallas_src>

<mosaic_0001>
module attributes {stable_mosaic.version = 11 : i64} {
  func.func @_testodef_kernel(%arg0: i32, %arg1: memref<10xf32, #tpu.memory_space<smem>>, %arg2: memref<2x128xf32, #tpu.memory_space<vmem>>, %arg3: memref<2x128xf32, #tpu.memory_space<vmem>>) attributes {dimension_semantics = [#tpu.dimension_semantics<parallel>], iteration_bounds = array<i64: 1>, scalar_prefetch = 0 : i64, scratch_operands = 0 : i64, tpu.core_type = #tpu.core_type<tc>, window_params = [{transform_indices = @transform_0, window_bounds = array<i64: 10>}, {transform_indices = @transform_1, window_bounds = array<i64: 2, 128>}, {transform_indices = @transform_2, window_bounds = array<i64: 2, 128>}]} {
    %c0 = arith.constant 0 : index
    %c0_0 = arith.constant 0 : index
    %0 = vector.load %arg2[%c0, %c0_0] : memref<2x128xf32, #tpu.memory_space<vmem>>, vector<2x128xf32>
    %1 = vector.extract_strided_slice %0 {offsets = [0, 0], sizes = [1, 128], strides = [1, 1]} : vector<2x128xf32> to vector<1x128xf32>
    %2 = vector.extract_strided_slice %0 {offsets = [1, 0], sizes = [1, 128], strides = [1, 1]} : vector<2x128xf32> to vector<1x128xf32>
    %c0_1 = arith.constant 0 : index
    %3 = memref.load %arg1[%c0_1] : memref<10xf32, #tpu.memory_space<smem>>
    %c1 = arith.constant 1 : index
    %4 = memref.load %arg1[%c1] : memref<10xf32, #tpu.memory_space<smem>>
    %c2 = arith.constant 2 : index
    %5 = memref.load %arg1[%c2] : memref<10xf32, #tpu.memory_space<smem>>
    %c3 = arith.constant 3 : index
    %6 = memref.load %arg1[%c3] : memref<10xf32, #tpu.memory_space<smem>>
    %c4 = arith.constant 4 : index
    %7 = memref.load %arg1[%c4] : memref<10xf32, #tpu.memory_space<smem>>
    %c5 = arith.constant 5 : index
    %8 = memref.load %arg1[%c5] : memref<10xf32, #tpu.memory_space<smem>>
    %c6 = arith.constant 6 : index
    %9 = memref.load %arg1[%c6] : memref<10xf32, #tpu.memory_space<smem>>
    %c7 = arith.constant 7 : index
    %10 = memref.load %arg1[%c7] : memref<10xf32, #tpu.memory_space<smem>>
    %c8 = arith.constant 8 : index
    %11 = memref.load %arg1[%c8] : memref<10xf32, #tpu.memory_space<smem>>
    %c9 = arith.constant 9 : index
    %12 = memref.load %arg1[%c9] : memref<10xf32, #tpu.memory_space<smem>>
    %13 = vector.broadcast %3 : f32 to vector<1x128xf32>
    %14 = arith.mulf %13, %1 : vector<1x128xf32>
    %15 = vector.broadcast %4 : f32 to vector<1x128xf32>
    %16 = arith.mulf %15, %2 : vector<1x128xf32>
    %17 = arith.addf %14, %16 : vector<1x128xf32>
    %cst = arith.constant 0.000000e+00 : f32
    %18 = vector.broadcast %cst : f32 to vector<1x128xf32>
    %19 = arith.subf %18, %17 : vector<1x128xf32>
    %20 = math.exp %19 : vector<1x128xf32>
    %cst_2 = arith.constant 1.000000e+00 : f32
    %21 = vector.broadcast %cst_2 : f32 to vector<1x128xf32>
    %22 = arith.addf %21, %20 : vector<1x128xf32>
    %23 = tpu.reciprocal %22 : vector<1x128xf32> -> vector<1x128xf32>
    %24 = arith.mulf %20, %23 : vector<1x128xf32>
    %25 = vector.broadcast %3 : f32 to vector<1x128xf32>
    %26 = arith.subf %1, %25 : vector<1x128xf32>
    %27 = vector.broadcast %4 : f32 to vector<1x128xf32>
    %28 = arith.subf %2, %27 : vector<1x128xf32>
    %29 = vector.broadcast %3 : f32 to vector<1x128xf32>
    %30 = arith.addf %1, %29 : vector<1x128xf32>
    %31 = vector.broadcast %4 : f32 to vector<1x128xf32>
    %32 = arith.addf %2, %31 : vector<1x128xf32>
    %33 = vector.broadcast %5 : f32 to vector<1x128xf32>
    %34 = arith.mulf %33, %26 : vector<1x128xf32>
    %35 = vector.broadcast %6 : f32 to vector<1x128xf32>
    %36 = arith.mulf %35, %28 : vector<1x128xf32>
    %37 = arith.addf %34, %36 : vector<1x128xf32>
    %38 = arith.mulf %23, %37 : vector<1x128xf32>
    %39 = vector.broadcast %9 : f32 to vector<1x128xf32>
    %40 = arith.mulf %39, %30 : vector<1x128xf32>
    %41 = vector.broadcast %10 : f32 to vector<1x128xf32>
    %42 = arith.mulf %41, %32 : vector<1x128xf32>
    %43 = arith.addf %40, %42 : vector<1x128xf32>
    %44 = arith.mulf %24, %43 : vector<1x128xf32>
    %45 = arith.addf %38, %44 : vector<1x128xf32>
    %46 = vector.broadcast %7 : f32 to vector<1x128xf32>
    %47 = arith.mulf %46, %26 : vector<1x128xf32>
    %48 = vector.broadcast %8 : f32 to vector<1x128xf32>
    %49 = arith.mulf %48, %28 : vector<1x128xf32>
    %50 = arith.addf %47, %49 : vector<1x128xf32>
    %51 = arith.mulf %23, %50 : vector<1x128xf32>
    %52 = vector.broadcast %11 : f32 to vector<1x128xf32>
    %53 = arith.mulf %52, %30 : vector<1x128xf32>
    %54 = vector.broadcast %12 : f32 to vector<1x128xf32>
    %55 = arith.mulf %54, %32 : vector<1x128xf32>
    %56 = arith.addf %53, %55 : vector<1x128xf32>
    %57 = arith.mulf %24, %56 : vector<1x128xf32>
    %58 = arith.addf %51, %57 : vector<1x128xf32>
    %c0_3 = arith.constant 0 : index
    %c0_4 = arith.constant 0 : index
    %59 = vector.load %arg3[%c0_3, %c0_4] : memref<2x128xf32, #tpu.memory_space<vmem>>, vector<1x128xf32>
    tpu.vector_store %arg3[%c0_3, %c0_4], %45 {strides = array<i32>} : memref<2x128xf32, #tpu.memory_space<vmem>>, vector<1x128xf32>,
    %c1_5 = arith.constant 1 : index
    %c0_6 = arith.constant 0 : index
    %60 = vector.load %arg3[%c1_5, %c0_6] : memref<2x128xf32, #tpu.memory_space<vmem>>, vector<1x128xf32>
    tpu.vector_store %arg3[%c1_5, %c0_6], %58 {strides = array<i32>} : memref<2x128xf32, #tpu.memory_space<vmem>>, vector<1x128xf32>,
    return
  }
  func.func @transform_0(%arg0: i32) -> i32 {
    %c0_i32 = arith.constant 0 : i32
    %c0_i32_0 = arith.constant 0 : i32
    return %c0_i32 : i32
  }
  func.func @transform_1(%arg0: i32) -> (i32, i32) {
    %c0_i32 = arith.constant 0 : i32
    %c0_i32_0 = arith.constant 0 : i32
    return %c0_i32, %arg0 : i32, i32
  }
  func.func @transform_2(%arg0: i32) -> (i32, i32) {
    %c0_i32 = arith.constant 0 : i32
    %c0_i32_0 = arith.constant 0 : i32
    return %c0_i32, %arg0 : i32, i32
  }
}

</mosaic_0001>

<bundles_post_ra>
// kernel: tpu_custom_call.1
= control target key start
LH: loop header
LB: loop body
LE: loop exit
PB: predicated region body
PF: predicated region fallthrough
CT: control target
= control target key end

     0   :  { %7 = vsyncpa [#allocation4], 0  ;;  %s202_s0 = inlined_call_operand.hbm [shape: f32[10], index: 0, kind: input, shape index: {}]   ;;  %s203_s1 = inlined_call_operand.vmem [shape: f32[2,128], index: 1, kind: input, shape index: {}]   ;;  %s204_s2 = inlined_call_operand.hbm [shape: f32[2,128], index: 2, kind: output, shape index: {}]  }
   0x1   :  { %8 = vsyncpa [#allocation3], 0  ;;  %s122_s11 = scalar_lea.hbm %s202_s0, 16 }
   0x2   :  { %p123_p0 = scmp.ne.s32.totalorder %s202_s0, %s122_s11  ;;  %p126_p1 = scmp.lt.u32.totalorder %s122_s11, %s202_s0 }
   0x4   :  { %p128_p2 = pnand %p126_p1, %p123_p0 }
   0x6   :  { %131 = shalt.err (!%p128_p2)
}
   0x7   :  { %s158_s16 = smov [#allocation2]  }
   0x8   :  { %16 = dma.hbm_to_smem %s202_s0, 16, %s158_s16, [#allocation4]  }
   0x9   :  { %154 = dma.done.wait [#allocation4], 16  }
   0xa   :  { %155 = vsyncadd [#allocation4], 4294967280 }
   0xb   :  { %22 = sfence }
   0xc   :  { %s24_s19 = sld [smem:[#allocation2]]  ;;  %s107_s20 = sld [smem:[#allocation2 + $0x1]]  ;;  %v23_v0 = vld [vmem:[%s203_s1] sm:$0x3] }
   0xd   :  { %s109_s23 = sld [smem:[#allocation2 + $0x3]]  ;;  %s111_s0 = sld [smem:[#allocation2 + $0x5]] }
   0xe   :  { %s113_s24 = sld [smem:[#allocation2 + $0x7]]  ;;  %s115_s25 = sld [smem:[#allocation2 + $0x9]] }
   0xf   :  { %s108_s26 = sld [smem:[#allocation2 + $0x2]]  ;;  %s110_s27 = sld [smem:[#allocation2 + $0x4]] }
  0x10   :  { %s112_s28 = sld [smem:[#allocation2 + $0x6]]  ;;  %s114_s29 = sld [smem:[#allocation2 + $0x8]] }
  0x11   :  { %s159_s1 = smov [#allocation5]  }
  0x12   :  { %v34_v1 = vstv %s24_s19  ;;  %v36_v2 = vstv %s107_s20  ;;  %s98_s30 = sshll.u32 %s159_s1, 4  ;;  %s99_s30 = int_to_ptr.vmem [resolvable:$true] %s98_s30 }
  0x13   :  { %v35_v3 = vmul.f32 %v34_v1, %v23_v0  ;;  %v37_v4 = vmul.f32 %v36_v2, %v23_v0  ;;  %v49_v9 = vsub.f32 %v23_v0, %v36_v2  ;;  %v54_v10 = vstv %s109_s23  ;;  %s132_s3 = scalar_lea.vmem %s99_s30, 32  ;;  %p137_p4 = scmp.lt.s32.totalorder %s99_s30, %s99_s30 }
  0x14   :  { %v73_v11 = vstv %s111_s0  ;;  %v51_v13 = vadd.f32 %v36_v2, %v23_v0  ;;  %v63_v15 = vstv %s113_s24  ;;  %v82_v16 = vstv %s115_s25  ;;  %p133_p3 = scmp.ne.s32.totalorder %s99_s30, %s132_s3  ;;  %p138_p5 = scmp.lt.s32.totalorder %s132_s3, %s132_s3 }
  0x15   :  { %v39_v5 = vrot.slane %v37_v4, 1  ;;  %v48_v17 = vsub.f32 %v23_v0, %v34_v1  ;;  %v55_v18 = vmul.f32 %v54_v10, %v49_v9  ;;  %v74_v19 = vmul.f32 %v73_v11, %v49_v9 }
  0x16   :  { %v52_v20 = vstv %s108_s26  ;;  %v71_v21 = vstv %s110_s27  ;;  %v50_v22 = vadd.f32 %v34_v1, %v23_v0  ;;  %v64_v23 = vmul.f32 %v63_v15, %v51_v13  ;;  %p139_p6 = por %p138_p5, %p137_p4 }
  0x17   :  { %v41_v6 = vadd.f32 %v39_v5, %v35_v3  ;;  %v83_v24 = vmul.f32 %v82_v16, %v51_v13  ;;  %v61_v25 = vstv %s112_s28  ;;  %v80_v26 = vstv %s114_s29 }
  0x18   :  { %v53_v27 = vmul.f32 %v52_v20, %v48_v17  ;;  %v57_v28 = vrot.slane %v55_v18, 1  ;;  %v72_v29 = vmul.f32 %v71_v21, %v48_v17  ;;  %v76_v30 = vrot.slane %v74_v19, 1  ;;  %p140_p7 = pnand %p139_p6, %p133_p3 }
  0x19   :  { %v42_v7 = vsub.f32 0.0, %v41_v6  ;;  %v62_v31 = vmul.f32 %v61_v25, %v50_v22  ;;  %v66_v32 = vrot.slane %v64_v23, 1  ;;  %v81_v33 = vmul.f32 %v80_v26, %v50_v22 }
  0x1a   :  { %v85_v34 = vrot.slane %v83_v24, 1  ;;  %v59_v35 = vadd.f32 %v57_v28, %v53_v27  ;;  %v78_v36 = vadd.f32 %v76_v30, %v72_v29 }
  0x1b   :  { %v43_v8 = vmul.f32 1.442695, %v42_v7  ;;  %v68_v37 = vadd.f32 %v66_v32, %v62_v31 }
  0x1c   :  { %v87_v38 = vadd.f32 %v85_v34, %v81_v33 }
  0x1d   :  { %118 = vpow2.f32 %v43_v8 }
  0x27   :  { %v119_v12 = vpop.eup %118 }
  0x28   :  { %v45_v14 = vadd.f32 1.0, %v119_v12 }
  0x2a   :  { %120 = vrcp.f32 %v45_v14 }
  0x34   :  { %v121_v39 = vpop.eup %120 }
  0x35   :  { %v47_v40 = vmul.f32 %v121_v39, %v119_v12  ;;  %v60_v41 = vmul.f32 %v121_v39, %v59_v35  ;;  %v79_v42 = vmul.f32 %v121_v39, %v78_v36 }
  0x37   :  { %v69_v43 = vmul.f32 %v68_v37, %v47_v40  ;;  %v88_v44 = vmul.f32 %v87_v38, %v47_v40 }
  0x39   :  { %v70_v45 = vadd.f32 %v69_v43, %v60_v41  ;;  %v89_v46 = vadd.f32 %v88_v44, %v79_v42 }
  0x3b   :  { %90 = vst [vmem:[#allocation5] sm:$0x1] %v70_v45  ;;  %91 = vst [vmem:[#allocation5 + $0x1] sm:$0x1] %v89_v46 }
  0x3c   :  { %143 = shalt.err (!%p140_p7)
}
  0x3d   :  { %s144_s6 = scalar_lea.hbm %s204_s2, 32 }
  0x3e   :  { %p145_p8 = scmp.ne.s32.totalorder %s204_s2, %s144_s6  ;;  %p148_p9 = scmp.lt.u32.totalorder %s144_s6, %s204_s2 }
  0x40   :  { %p150_p10 = pnand %p148_p9, %p145_p8 }
  0x42   :  { %153 = shalt.err (!%p150_p10)
}
  0x43   :  { %101 = dma.vmem_to_hbm [thread:$0]  %s99_s30, 32, %s204_s2, [#allocation3]  }
  0x44   :  { %156 = dma.done.wait [#allocation3], 32  }
  0x45   :  { %157 = vsyncadd [#allocation3], 4294967264 }
  0x46   :  { %105 = vsyncpa [#allocation3], 1 }
  0x47   :  { %106 = vsyncpa [#allocation4], 1 }

</bundles_post_ra>
